<compile_context>
chip_gen: v6e
topology: v6e:2x2x1
jax: 0.10.0
libtpu: 0.0.40
codegen_flags: <defaults>
</compile_context>

<pallas_src>
import functools

import jax
import jax.numpy as jnp
from jax import lax
from jax.experimental import pallas as pl
from jax.experimental.pallas import tpu as pltpu

EPS = 1e-5  # BatchNorm2d default eps


def _fused_conv_relu_bn_kernel(p_ref, w_ref, b_ref, o_ref, *, p_actual):
    """One-shot: fused-conv matmul + bias + relu + batch-stats + normalize.

    p_ref: (27, P_pad)  im2col patches, transposed (lane-dense P axis)
    w_ref: (8, 27)      fused conv weight
    b_ref: (8, 1)       fused conv bias
    o_ref: (8, P_pad)   normalized output
    """
    y = jnp.dot(w_ref[...], p_ref[...], preferred_element_type=jnp.float32)
    y = y + b_ref[...]
    y = jnp.maximum(y, 0.0)                       # fused (conv1 + tiled conv2) + relu

    # Mask the zero-padded tail columns so they don't pollute the BN stats.
    col = lax.broadcasted_iota(jnp.int32, y.shape, 1)
    ym = jnp.where(col < p_actual, y, 0.0)

    inv_p = 1.0 / p_actual
    mean = jnp.sum(ym, axis=1, keepdims=True) * inv_p            # (8, 1)
    var = jnp.sum(ym * ym, axis=1, keepdims=True) * inv_p - mean * mean
    scale = lax.rsqrt(var + EPS)                                  # gamma = 1 (default init)

    o_ref[...] = (y - mean) * scale                               # beta = 0 (default init)


def model_forward(x, w1, b1, w2, b2):
    """x: (N, 3, H, W) float32 (NCHW, like PyTorch). Returns flat (N*8*OH*OW,)."""
    n, c, h, w = x.shape
    kh = kw = 3
    s = 3
    oh = (h - kh) // s + 1
    ow = (w - kw) // s + 1
    oc = w1.shape[0]                      # 8
    oc2 = w2.shape[0]                     # 4
    ckk = c * kh * kw                     # 27
    p_actual = n * oh * ow                # 25 for the module's shape
    p_pad = max(128, ((p_actual + 127) // 128) * 128)

    # Grid-less single-block path only (whole working set must fit easily in VMEM).
    assert (ckk + oc) * p_pad * 4 < 8 * 1024 * 1024, "shape too large for grid-less path"

    # ---- wrapper-side prep (tiny, static shapes) -----------------------------
    # im2col packed directly in (C*KH*KW, P) layout so P sits on the lane axis.
    # stride == kernel size, so this is a pure permutation (no duplication).
    patches_t = (
        x[:, :, : oh * s, : ow * s]
        .reshape(n, c, oh, kh, ow, kw)
        .transpose(1, 3, 5, 0, 2, 4)              # (C, KH, KW, N, OH, OW)
        .reshape(ckk, p_actual)
        .astype(jnp.float32)
    )
    patches_t = jnp.pad(patches_t, ((0, 0), (0, p_pad - p_actual)))

    # Fold the two convolutions into one fused weight / bias.
    rep = oc // oc2
    wm1 = w1.reshape(oc, ckk).astype(jnp.float32)                          # (8, 27)
    wm2 = w2.reshape(oc2, ckk).astype(jnp.float32)                         # (4, 27)
    w_fused = wm1 + jnp.tile(wm2, (rep, 1))                                # (8, 27)
    b_fused = (b1.astype(jnp.float32)
               + jnp.tile(b2.astype(jnp.float32), rep)).reshape(oc, 1)     # (8, 1)

    vmem = pl.BlockSpec(memory_space=pltpu.MemorySpace.VMEM)

    # ---- single fused kernel call (no grid, no pipelining machinery) --------
    out2d = pl.pallas_call(
        functools.partial(_fused_conv_relu_bn_kernel, p_actual=p_actual),
        in_specs=[vmem, vmem, vmem],
        out_specs=vmem,
        out_shape=jax.ShapeDtypeStruct((oc, p_pad), jnp.float32),
    )(patches_t, w_fused, b_fused)

    # (OC, N*OH*OW) -> NCHW flatten order (pure reshape for N=1).
    if n == 1:
        out = out2d[:, :p_actual].reshape(-1)
    else:
        out = (out2d[:, :p_actual]
               .reshape(oc, n, oh * ow)
               .transpose(1, 0, 2)
               .reshape(-1))
    return out


def reference_forward(x, w1, b1, w2, b2):
    dn = ("NCHW", "OIHW", "NCHW")
    v1 = lax.conv_general_dilated(x, w1, (3, 3), "VALID", dimension_numbers=dn) + b1.reshape(1, -1, 1, 1)
    v2 = lax.conv_general_dilated(x, w2, (3, 3), "VALID", dimension_numbers=dn) + b2.reshape(1, -1, 1, 1)
    v3 = v1 + jnp.concatenate([v2, v2], axis=1)
    v4 = jnp.maximum(v3, 0.0)
    mean = v4.mean(axis=(0, 2, 3), keepdims=True)
    var = ((v4 - mean) ** 2).mean(axis=(0, 2, 3), keepdims=True)
    v5 = (v4 - mean) * lax.rsqrt(var + EPS)
    return v5.reshape(-1)


if __name__ == "__main__":
    key = jax.random.PRNGKey(0)
    kx, k1, k2, k3, k4 = jax.random.split(key, 5)

    # deterministic inputs / params (shapes from the torch module __init__)
    x1 = jax.random.normal(kx, (1, 3, 16, 16), dtype=jnp.float32)
    w1 = 0.1 * jax.random.normal(k1, (8, 3, 3, 3), dtype=jnp.float32)  # conv1 weight (OIHW)
    b1 = 0.1 * jax.random.normal(k2, (8,), dtype=jnp.float32)          # conv1 bias
    w2 = 0.1 * jax.random.normal(k3, (4, 3, 3, 3), dtype=jnp.float32)  # conv2 weight (OIHW)
    b2 = 0.1 * jax.random.normal(k4, (4,), dtype=jnp.float32)          # conv2 bias

    out = jax.jit(model_forward)(x1, w1, b1, w2, b2)
    out = jax.block_until_ready(out)

    ref = jax.block_until_ready(reference_forward(x1, w1, b1, w2, b2))
    assert out.shape == (1 * 8 * 5 * 5,), out.shape
    assert jnp.allclose(out, ref, atol=1e-4, rtol=1e-4), float(jnp.max(jnp.abs(out - ref)))

    print("KERNEL_OK")
</pallas_src>

<mosaic_0001>
module attributes {stable_mosaic.version = 11 : i64} {
  func.func @_fused_conv_relu_bn_kernel(%arg0: memref<27x128xf32, #tpu.memory_space<vmem>>, %arg1: memref<8x27xf32, #tpu.memory_space<vmem>>, %arg2: memref<8x1xf32, #tpu.memory_space<vmem>>, %arg3: memref<8x128xf32, #tpu.memory_space<vmem>>) attributes {dimension_semantics = [], scalar_prefetch = 0 : i64, scratch_operands = 0 : i64, tpu.core_type = #tpu.core_type<tc>} {
    %c0 = arith.constant 0 : index
    %c0_0 = arith.constant 0 : index
    %0 = vector.load %arg1[%c0, %c0_0] : memref<8x27xf32, #tpu.memory_space<vmem>>, vector<8x27xf32>
    %c0_1 = arith.constant 0 : index
    %c0_2 = arith.constant 0 : index
    %1 = vector.load %arg0[%c0_1, %c0_2] : memref<27x128xf32, #tpu.memory_space<vmem>>, vector<27x128xf32>
    %cst = arith.constant dense<0.000000e+00> : vector<8x128xf32>
    %2 = tpu.matmul %0, %1, %cst {dimension_numbers = #tpu.dot_dimension_numbers<[1], [0], [0], [1], [0, 0, 1, 1], [], []>} : vector<8x27xf32>, vector<27x128xf32>, vector<8x128xf32> -> vector<8x128xf32>
    %c0_3 = arith.constant 0 : index
    %c0_4 = arith.constant 0 : index
    %3 = vector.load %arg2[%c0_3, %c0_4] : memref<8x1xf32, #tpu.memory_space<vmem>>, vector<8x1xf32>
    %4 = vector.broadcast %3 : vector<8x1xf32> to vector<8x128xf32>
    %5 = arith.addf %2, %4 : vector<8x128xf32>
    %cst_5 = arith.constant 0.000000e+00 : f32
    %6 = vector.broadcast %cst_5 : f32 to vector<8x128xf32>
    %7 = arith.maximumf %5, %6 : vector<8x128xf32>
    %8 = tpu.iota {dimensions = array<i32: 1>} : vector<8x128xi32>
    %c25_i32 = arith.constant 25 : i32
    %9 = vector.broadcast %c25_i32 : i32 to vector<8x128xi32>
    %10 = arith.cmpi slt, %8, %9 : vector<8x128xi32>
    %cst_6 = arith.constant 0.000000e+00 : f32
    %11 = vector.broadcast %cst_6 : f32 to vector<8x128xf32>
    %12 = arith.select %10, %7, %11 : vector<8x128xi1>, vector<8x128xf32>
    %cst_7 = arith.constant dense<0.000000e+00> : vector<8xf32>
    %13 = vector.multi_reduction <add>, %12, %cst_7 [1] : vector<8x128xf32> to vector<8xf32>
    %14 = vector.shape_cast %13 : vector<8xf32> to vector<8x1xf32>
    %cst_8 = arith.constant 4.000000e-02 : f32
    %15 = vector.broadcast %cst_8 : f32 to vector<8x1xf32>
    %16 = arith.mulf %14, %15 : vector<8x1xf32>
    %17 = arith.mulf %12, %12 : vector<8x128xf32>
    %cst_9 = arith.constant dense<0.000000e+00> : vector<8xf32>
    %18 = vector.multi_reduction <add>, %17, %cst_9 [1] : vector<8x128xf32> to vector<8xf32>
    %19 = vector.shape_cast %18 : vector<8xf32> to vector<8x1xf32>
    %cst_10 = arith.constant 4.000000e-02 : f32
    %20 = vector.broadcast %cst_10 : f32 to vector<8x1xf32>
    %21 = arith.mulf %19, %20 : vector<8x1xf32>
    %22 = arith.mulf %16, %16 : vector<8x1xf32>
    %23 = arith.subf %21, %22 : vector<8x1xf32>
    %cst_11 = arith.constant 9.99999974E-6 : f32
    %24 = vector.broadcast %cst_11 : f32 to vector<8x1xf32>
    %25 = arith.addf %23, %24 : vector<8x1xf32>
    %26 = math.rsqrt %25 : vector<8x1xf32>
    %27 = vector.broadcast %16 : vector<8x1xf32> to vector<8x128xf32>
    %28 = arith.subf %7, %27 : vector<8x128xf32>
    %29 = vector.broadcast %26 : vector<8x1xf32> to vector<8x128xf32>
    %30 = arith.mulf %28, %29 : vector<8x128xf32>
    %c0_12 = arith.constant 0 : index
    %c0_13 = arith.constant 0 : index
    %31 = vector.load %arg3[%c0_12, %c0_13] : memref<8x128xf32, #tpu.memory_space<vmem>>, vector<8x128xf32>
    tpu.vector_store %arg3[%c0_12, %c0_13], %30 {strides = array<i32>} : memref<8x128xf32, #tpu.memory_space<vmem>>, vector<8x128xf32>,
    return
  }
}

</mosaic_0001>

<bundles_post_ra>
// kernel: tile.16
= control target key start
LH: loop header
LB: loop body
LE: loop exit
PB: predicated region body
PF: predicated region fallthrough
CT: control target
= control target key end

     0   :  { %s22_s0 = inlined_call_operand.vmem [shape: f32[4], index: 0, kind: input, shape index: {}]   ;;  %s23_s1 = inlined_call_operand.vmem [shape: f32[2,4], index: 1, kind: output, shape index: {}]  }
   0x1   :  { %v4_v0 = vld [vmem:[%s22_s0] ss:$0 sm:$0xff] }
   0x2   :  { %5 = vst [vmem:[%s23_s1] sm:$0x3] %v4_v0 }

// kernel: tile.17
= control target key start
LH: loop header
LB: loop body
LE: loop exit
PB: predicated region body
PF: predicated region fallthrough
CT: control target
= control target key end

     0   :  { %vm8_vm0 = vcmask 31744   ;;  %vm14_vm1 = vcmask 64544   ;;  %s42_s0 = inlined_call_operand.vmem [shape: f32[2,4], index: 0, kind: input, shape index: {}]   ;;  %s43_s1 = inlined_call_operand.vmem [shape: f32[8], index: 1, kind: output, shape index: {}]  }
   0x1   :  { %v5_v0 = vld [vmem:[%s42_s0] sm:$0x3]  ;;  %s25_s0 = smov 4  }
   0x2   :  { %6 = vst [vmem:[#allocation1] sm:$0x3] %v5_v0 }
   0x9   :  { %v11_v1 = vld [vmem:[#allocation1 + $0x1] sm:$0x1]   ;;  %v7_v2 = vld [vmem:[#allocation1] sm:$0x1]  }
   0xa   :  { %12 = vrot.lane.b32.xlu0 %v11_v1, %s25_s0  ;;  %9 = vst.msk [vmem:[#allocation0] sm:$0x1] %vm8_vm0, %v7_v2  }
  0x7c   :  { %v13_v3 = vpop.permute.xlu0 %12  }
  0x7d   :  { %15 = vst.msk [vmem:[#allocation0] sm:$0x1] %vm14_vm1, %v13_v3  }
  0x84   :  { %v20_v4 = vld [vmem:[#allocation0] sm:$0x1] }
  0x85   :  { %23 = vst [vmem:[%s43_s1] sm:$0x1] %v20_v4 }

// kernel: model_forward.1
= control target key start
LH: loop header
LB: loop body
LE: loop exit
PB: predicated region body
PF: predicated region fallthrough
CT: control target
= control target key end

     0   :  { %vm29_vm0 = vcmask 1042432   ;;  %v150_v0 = vmov 0.0   ;;  %vm151_vm1 = vmmov 0   ;;  %v152_v3 = vmov 0   ;;  %s194_s0 = inlined_call_operand.vmem [shape: f32[27,128], index: 0, kind: input, shape index: {}]   ;;  %s195_s2 = inlined_call_operand.vmem [shape: f32[8,1], index: 2, kind: input, shape index: {}]   ;;  %s196_s1 = inlined_call_operand.vmem [shape: f32[8,27], index: 1, kind: input, shape index: {}]   ;;  %s197_s3 = inlined_call_operand.vmem [shape: f32[8,128], index: 3, kind: output, shape index: {}]  }
   0x1   :  { %133 = vmatprep.subr.mxu0 %v150_v0  ;;  %v18_v1 = vld [vmem:[%s194_s0 + $0x18] sm:$0x7]  ;;  %v17_v2 = vld [vmem:[%s194_s0 + $0x10] sm:$0xff]  ;;  %141 = vmatprep.mubr.msk.f32.mxu0 %vm151_vm1, %v150_v0  ;;  %v19_v4 = vld [vmem:[%s195_s2] sm:$0xff]  ;;  %vm25_vm2 = vcmask 220160   ;;  %v104_v8 = vlaneseq }
   0x2   :  { %134 = vmatpush3.msk.msra.mxu0 %vm29_vm0, %v18_v1  ;;  %147 = vset.pattern.permute.xlu0 %v152_v3  ;;  %v16_v5 = vld [vmem:[%s194_s0 + $0x8] sm:$0xff]  ;;  %v15_v6 = vld [vmem:[%s194_s0] sm:$0xff] }
   0x3   :  { %135 = vmatprep.subr.mxu0 %v150_v0  ;;  %22 = vperm.xlu0 %147, %v19_v4   ;;  %v14_v7 = vld [vmem:[%s196_s1] sm:$0xff]  ;;  %v105_v10 = vand.u32 127, %v104_v8 }
   0x4   :  { %136 = vmatpush3.msra.mxu0 %v17_v2 }
   0x5   :  { %137 = vmatprep.subr.mxu0 %v150_v0  ;;  %vm106_vm3 = vcmp.lt.s32.totalorder %v105_v10, 25 }
   0x6   :  { %138 = vmatpush3.msra.mxu0 %v16_v5 }
   0x7   :  { %139 = vmatprep.subr.mxu0 %v150_v0 }
   0x8   :  { %140 = vmatpush3.msra.mxu0 %v15_v6 }
   0x9   :  { %142 = vmatmul.mubr.msk.f32.vlgmr.msra.gmra.mxu0 %vm25_vm2, %v14_v7 }
  0x7e   :  { %v23_v9 = vpop.permute.xlu0 %22 }
  0xc9   :  { %v99_v11 = vpop.f32.mrf.mxu0 }
  0xca   :  { %v100_v12 = vadd.f32 %v99_v11, %v23_v9 }
  0xcb   :  { %v143_v13 = vpop.f32.mrf.mxu0 }
  0xcc   :  { %v103_v14 = vmax.f32 %v100_v12, 0.0 }
  0xce   :  { %v107_v15 = vsel %vm106_vm3, %v103_v14, 0.0 }
  0xcf   :  { %108 = vadd.xlane.f32.xlu0 %v107_v15  ;;  %v111_v16 = vmul.f32 %v107_v15, %v107_v15 }
  0xd1   :  { %112 = vadd.xlane.f32.xlu1 %v111_v16 }
 0x158   :  { %v109_v17 = vpop.xlane.xlu0 %108 }
 0x159   :  { %v110_v18 = vmul.f32 0.04, %v109_v17 }
 0x15a   :  { %v113_v19 = vpop.xlane.xlu1 %112 }
 0x15b   :  { %v115_v20 = vmul.f32 %v110_v18, %v110_v18  ;;  %v114_v21 = vmul.f32 0.04, %v113_v19  ;;  %v119_v24 = vsub.f32 %v103_v14, %v110_v18 }
 0x15d   :  { %v116_v22 = vsub.f32 %v114_v21, %v115_v20 }
 0x15f   :  { %v117_v23 = vadd.f32 1e-05, %v116_v22 }
 0x161   :  { %148 = vrsqrt.f32 %v117_v23 }
 0x16e   :  { %v149_v25 = vpop.eup %148 }
 0x16f   :  { %v120_v26 = vmul.f32 %v149_v25, %v119_v24 }
 0x171   :  { %121 = vst [vmem:[%s197_s3] sm:$0xff] %v120_v26 }

</bundles_post_ra>
